<compile_context>
chip_gen: v5e
topology: v5e:2x2
jax: 0.10.0
libtpu: 0.0.40
codegen_flags: <defaults>
</compile_context>

<pallas_src>
import functools
import math

import jax
import jax.numpy as jnp
from jax import lax
from jax.experimental import pallas as pl
from jax.experimental.pallas import tpu as pltpu


# --------------------------------------------------------------------------
# Per-generation defaults (VMEM budget, linear tiles, attention kv tile).
# --------------------------------------------------------------------------
def _tpu_defaults():
    kind = ""
    try:
        kind = jax.devices()[0].device_kind.lower()
    except Exception:
        pass
    if "7x" in kind or "v7" in kind:
        # 64 MiB VMEM per TensorCore -> smaller explicit budget, 256-wide MXU.
        return dict(vmem=40 * 1024 * 1024, lin_tiles=(512, 512, 512), tq=128, tkv=256)
    if "v6" in kind:
        # 128 MiB VMEM, 256-wide MXU.
        return dict(vmem=96 * 1024 * 1024, lin_tiles=(512, 512, 1024), tq=128, tkv=256)
    if "v5 lite" in kind or "v5e" in kind or "v5lite" in kind:
        # 128 MiB VMEM, 128-wide MXU -> tkv=256 buys nothing, keep 128.
        return dict(vmem=96 * 1024 * 1024, lin_tiles=(512, 512, 1024), tq=128, tkv=128)
    # Unknown part: conservative.
    return dict(vmem=40 * 1024 * 1024, lin_tiles=(512, 512, 512), tq=128, tkv=128)


# --------------------------------------------------------------------------
# Tile-size helpers (respect the (8, 128) sublane/lane blocking constraint:
# a block dim must be a multiple of 8 / 128, or equal the full dimension).
# --------------------------------------------------------------------------
def _tile_sublane(dim, target):
    if dim <= target:
        return dim
    t = (target // 8) * 8
    while t >= 8:
        if dim % t == 0:
            return t
        t -= 8
    return dim


def _tile_lane(dim, target):
    if dim <= target:
        return dim
    t = (target // 128) * 128
    while t >= 128:
        if dim % t == 0:
            return t
        t -= 128
    return dim


def _pick_head_block(H, D, cap_lanes=512):
    """Largest divisor of H with hb*D <= cap_lanes (lane-dense blocks, bounded VMEM)."""
    hb = H
    while hb > 1 and hb * D > cap_lanes:
        hb -= 1
        while hb > 1 and H % hb != 0:
            hb -= 1
    return max(hb, 1)


# --------------------------------------------------------------------------
# Kernel 1: tiled dense layer  y = x @ W + b   (W already in (K, N) layout)
# --------------------------------------------------------------------------
def _linear_kernel_inplace(x_ref, w_ref, b_ref, o_ref):
    """f32 output: accumulate directly into the resident output block."""
    k = pl.program_id(2)

    @pl.when(k == 0)
    def _init():
        o_ref[...] = jnp.zeros_like(o_ref)

    o_ref[...] += jnp.dot(x_ref[...], w_ref[...], preferred_element_type=jnp.float32)

    @pl.when(k == pl.num_programs(2) - 1)
    def _finalize():
        o_ref[...] += b_ref[...].astype(o_ref.dtype)   # bias added exactly once


def _linear_kernel_acc(x_ref, w_ref, b_ref, o_ref, acc_ref):
    """non-f32 output: keep an f32 VMEM accumulator."""
    k = pl.program_id(2)

    @pl.when(k == 0)
    def _init():
        acc_ref[...] = jnp.zeros_like(acc_ref)

    acc_ref[...] += jnp.dot(x_ref[...], w_ref[...], preferred_element_type=jnp.float32)

    @pl.when(k == pl.num_programs(2) - 1)
    def _finalize():
        o_ref[...] = (acc_ref[...] + b_ref[...].astype(jnp.float32)).astype(o_ref.dtype)


def linear_pallas(x2d, w_kn, b, *, tm, tn, tk, vmem_limit_bytes, out_dtype=None):
    """x2d: (M, K); w_kn: (K, N) (pre-transposed nn.Linear weight); b: (N,)."""
    M, K = x2d.shape
    Kw, N = w_kn.shape
    assert K == Kw, (K, Kw)
    out_dtype = out_dtype or x2d.dtype

    tm = _tile_sublane(M, tm)
    tn = _tile_lane(N, tn)
    tk = _tile_lane(K, tk)
    grid = (M // tm, N // tn, K // tk)

    b2 = b.reshape(1, N)
    inplace = jnp.dtype(out_dtype) == jnp.dtype(jnp.float32)
    kernel = _linear_kernel_inplace if inplace else _linear_kernel_acc
    scratch = [] if inplace else [pltpu.VMEM((tm, tn), jnp.float32)]

    return pl.pallas_call(
        kernel,
        out_shape=jax.ShapeDtypeStruct((M, N), out_dtype),
        grid_spec=pltpu.PrefetchScalarGridSpec(
            num_scalar_prefetch=0,
            grid=grid,
            in_specs=[
                pl.BlockSpec((tm, tk), lambda i, j, k: (i, k)),
                pl.BlockSpec((tk, tn), lambda i, j, k: (k, j)),
                pl.BlockSpec((1, tn), lambda i, j, k: (0, j)),
            ],
            out_specs=pl.BlockSpec((tm, tn), lambda i, j, k: (i, j)),
            scratch_shapes=scratch,
        ),
        compiler_params=pltpu.CompilerParams(
            dimension_semantics=("parallel", "parallel", "arbitrary"),
            vmem_limit_bytes=vmem_limit_bytes,
        ),
    )(x2d, w_kn, b2)


# --------------------------------------------------------------------------
# Kernel 2: splash-style causal flash attention.
#   qkv3: (3, B, H, T, D) passed three times (leading index selects q/k/v).
#   grid = (B, H//hb, n_pairs); the pair axis enumerates only the
#   lower-triangular (q_tile, kv_tile) pairs via scalar-prefetched qi/ki maps.
# --------------------------------------------------------------------------
def _flash_attn_kernel(qi_map_ref, ki_map_ref, q_ref, k_ref, v_ref, o_ref,
                       m_sc, l_sc, acc_sc, qs_sc,
                       *, scale, tq, tkv, compute_dtype):
    n = pl.program_id(2)
    qi = qi_map_ref[n]
    ki = ki_map_ref[n]

    @pl.when(ki == 0)
    def _init():
        m_sc[...] = jnp.full(m_sc.shape, -jnp.inf, m_sc.dtype)
        l_sc[...] = jnp.zeros_like(l_sc)
        acc_sc[...] = jnp.zeros_like(acc_sc)
        # hoist q load + 1/sqrt(D) scale (+ optional MXU cast) out of the kv loop
        q = q_ref[0, 0].astype(jnp.float32) * scale
        qs_sc[...] = q.astype(qs_sc.dtype)

    def _step(apply_mask):
        q = qs_sc[...]                               # (hb, tq, D), pre-scaled
        k = k_ref[0, 0]                              # (hb, tkv, D)
        v = v_ref[0, 0]                              # (hb, tkv, D)
        if compute_dtype is not None:
            k = k.astype(compute_dtype)
        # per-head QK^T, contracting D directly (no k transpose).
        s = jnp.einsum("hqd,hkd->hqk", q, k,
                       preferred_element_type=jnp.float32)   # (hb, tq, tkv)
        if apply_mask:
            # global offsets so tq != tkv is handled correctly
            row = qi * tq + lax.broadcasted_iota(jnp.int32, s.shape, 1)
            col = ki * tkv + lax.broadcasted_iota(jnp.int32, s.shape, 2)
            s = jnp.where(col <= row, s, -1e30)

        m_prev = m_sc[...]
        m_new = jnp.maximum(m_prev, jnp.max(s, axis=-1, keepdims=True))
        alpha = jnp.exp(m_prev - m_new)
        p = jnp.exp(s - m_new)
        l_sc[...] = alpha * l_sc[...] + jnp.sum(p, axis=-1, keepdims=True)
        pv_dtype = v.dtype if compute_dtype is None else compute_dtype
        acc_sc[...] = alpha * acc_sc[...] + jnp.einsum(
            "hqk,hkd->hqd", p.astype(pv_dtype), v.astype(pv_dtype),
            preferred_element_type=jnp.float32)
        m_sc[...] = m_new

    # only diagonal-straddling tiles pay the iota/compare/select mask cost
    needs_mask = (ki * tkv + tkv - 1) > (qi * tq)

    @pl.when(needs_mask)
    def _masked():
        _step(apply_mask=True)

    @pl.when(jnp.logical_not(needs_mask))
    def _unmasked():
        _step(apply_mask=False)

    # last kv tile for this q tile under causality -> normalize & store
    last_ki = (qi * tq + tq - 1) // tkv

    @pl.when(ki == last_ki)
    def _finalize():
        # exact normalization (runs once per q tile; cost is negligible)
        o_ref[0] = (acc_sc[...] / l_sc[...]).astype(o_ref.dtype)


def causal_flash_attention(qkv3, *, tq, tkv, vmem_limit_bytes, head_block=None,
                           compute_dtype=None, kv_buffer_count=None):
    """qkv3: (3, B, H, T, D) -> (B, H, T, D), causal softmax(QK^T/sqrt(D)) V."""
    _, B, H, T, D = qkv3.shape
    tq = _tile_sublane(T, tq)
    tkv = _tile_sublane(T, tkv)
    nq = T // tq
    nkv = T // tkv
    hb = head_block or _pick_head_block(H, D)
    assert H % hb == 0, (H, hb)

    # Enumerate only the causally-required (q_tile, kv_tile) pairs, kv-minor.
    pairs = [(i, j) for i in range(nq) for j in range(nkv)
             if j * tkv <= i * tq + tq - 1]
    qi_map = jnp.asarray([p[0] for p in pairs], dtype=jnp.int32)
    ki_map = jnp.asarray([p[1] for p in pairs], dtype=jnp.int32)
    n_pairs = len(pairs)

    kernel = functools.partial(
        _flash_attn_kernel, scale=1.0 / math.sqrt(D), tq=tq, tkv=tkv,
        compute_dtype=compute_dtype)

    q_spec = pl.BlockSpec((1, 1, hb, tq, D),
                          lambda b, g, n, qi, ki: (0, b, g, qi[n], 0))
    kv_kwargs = {}
    if kv_buffer_count is not None:        # optional deeper kv pipelining
        kv_kwargs = dict(pipeline_mode=pl.Buffered(kv_buffer_count))
    k_spec = pl.BlockSpec((1, 1, hb, tkv, D),
                          lambda b, g, n, qi, ki: (1, b, g, ki[n], 0),
                          **kv_kwargs)
    v_spec = pl.BlockSpec((1, 1, hb, tkv, D),
                          lambda b, g, n, qi, ki: (2, b, g, ki[n], 0),
                          **kv_kwargs)
    o_spec = pl.BlockSpec((1, hb, tq, D),
                          lambda b, g, n, qi, ki: (b, g, qi[n], 0))

    qs_dtype = compute_dtype or jnp.float32
    return pl.pallas_call(
        kernel,
        out_shape=jax.ShapeDtypeStruct((B, H, T, D), qkv3.dtype),
        grid_spec=pltpu.PrefetchScalarGridSpec(
            num_scalar_prefetch=2,
            grid=(B, H // hb, n_pairs),
            in_specs=[q_spec, k_spec, v_spec],
            out_specs=o_spec,
            scratch_shapes=[
                pltpu.VMEM((hb, tq, 1), jnp.float32),   # running max m
                pltpu.VMEM((hb, tq, 1), jnp.float32),   # running denom l
                pltpu.VMEM((hb, tq, D), jnp.float32),   # running accumulator
                pltpu.VMEM((hb, tq, D), qs_dtype),      # pre-scaled q tile
            ],
        ),
        compiler_params=pltpu.CompilerParams(
            dimension_semantics=("parallel", "parallel", "arbitrary"),
            vmem_limit_bytes=vmem_limit_bytes,
        ),
    )(qi_map, ki_map, qkv3, qkv3, qkv3)


# --------------------------------------------------------------------------
# Full forward pass.  `params` holds weights pre-transposed to (K, N) layout:
#   w_attn_t: (C, 3C), b_attn: (3C,), w_proj_t: (C, C), b_proj: (C,)
# --------------------------------------------------------------------------
def transformer_self_attention(x, params, heads, *, compute_dtype=None,
                               head_block=None, kv_buffer_count=None):
    B, T, C = x.shape
    D = C // heads
    cfg = _tpu_defaults()
    tm, tn, tk = cfg["lin_tiles"]
    vmem = cfg["vmem"]

    # fused qkv projection (tiled matmul, bias added once in-kernel)
    xf = x.reshape(B * T, C)
    if compute_dtype is not None:
        xf = xf.astype(compute_dtype)
    qkv = linear_pallas(xf, params["w_attn_t"], params["b_attn"],
                        tm=tm, tn=tn, tk=tk, vmem_limit_bytes=vmem,
                        out_dtype=x.dtype)                        # (B*T, 3C)

    # single head-major re-layout of the fused qkv activations; the attention
    # kernel reads q/k/v as leading-index 0/1/2 slices of this ONE array, so no
    # separate q/k/v slice copies are materialized in HBM.
    qkv3 = qkv.reshape(B, T, 3, heads, D).transpose(2, 0, 3, 1, 4)  # (3,B,H,T,D)

    y = causal_flash_attention(qkv3, tq=cfg["tq"], tkv=cfg["tkv"],
                               vmem_limit_bytes=vmem, head_block=head_block,
                               compute_dtype=compute_dtype,
                               kv_buffer_count=kv_buffer_count)     # (B,H,T,D)

    # TODO(synk): fold this (B,H,T,D)->(B,T,C) re-layout into the attention
    # out_spec (lane-dense (B,T,C) store) to remove the last XLA transpose pass.
    y = y.transpose(0, 2, 1, 3).reshape(B * T, C)
    if compute_dtype is not None:
        y = y.astype(compute_dtype)
    y = linear_pallas(y, params["w_proj_t"], params["b_proj"],
                      tm=tm, tn=tn, tk=tk, vmem_limit_bytes=vmem,
                      out_dtype=x.dtype)
    return y.reshape(B, T, C)


# --------------------------------------------------------------------------
# Pure-JAX reference (PyTorch-layout weights) for correctness checking.
# --------------------------------------------------------------------------
def reference(x, torch_params, heads):
    B, T, C = x.shape
    D = C // heads
    qkv = x @ torch_params["w_attn"].T + torch_params["b_attn"]
    q, k, v = jnp.split(qkv, 3, axis=-1)
    q = q.reshape(B, T, heads, D).transpose(0, 2, 1, 3)
    k = k.reshape(B, T, heads, D).transpose(0, 2, 1, 3)
    v = v.reshape(B, T, heads, D).transpose(0, 2, 1, 3)
    s = jnp.einsum("bhtd,bhsd->bhts", q, k) / math.sqrt(D)
    mask = jnp.tril(jnp.ones((T, T), dtype=bool))
    s = jnp.where(mask, s, -1e30)
    p = jax.nn.softmax(s, axis=-1)
    y = jnp.einsum("bhts,bhsd->bhtd", p, v)
    y = y.transpose(0, 2, 1, 3).reshape(B, T, C)
    return y @ torch_params["w_proj"].T + torch_params["b_proj"]


def _run_case(key, B, T, C, H):
    kx, k1, k2, k3, k4 = jax.random.split(key, 5)
    x = jax.random.normal(kx, (B, T, C), dtype=jnp.float32)
    torch_params = {
        "w_attn": 0.02 * jax.random.normal(k1, (3 * C, C), dtype=jnp.float32),
        "b_attn": 0.02 * jax.random.normal(k2, (3 * C,), dtype=jnp.float32),
        "w_proj": 0.02 * jax.random.normal(k3, (C, C), dtype=jnp.float32),
        "b_proj": 0.02 * jax.random.normal(k4, (C,), dtype=jnp.float32),
    }
    # weights stored pre-transposed once (no per-call w.T HBM pass); for a bf16
    # MXU path, cast them here ONCE instead of per-tile inside the kernel.
    kernel_params = {
        "w_attn_t": jnp.asarray(torch_params["w_attn"].T),
        "b_attn": torch_params["b_attn"],
        "w_proj_t": jnp.asarray(torch_params["w_proj"].T),
        "b_proj": torch_params["b_proj"],
    }

    out = transformer_self_attention(x, kernel_params, H)
    out = jax.block_until_ready(out)
    ref = reference(x, torch_params, H)

    assert out.shape == (B, T, C)
    assert jnp.allclose(out, ref, atol=2e-3, rtol=2e-3), (
        f"mismatch vs reference (B={B}, T={T}, C={C}, H={H}): "
        f"max abs err {jnp.max(jnp.abs(out - ref))}")


if __name__ == "__main__":
    key = jax.random.PRNGKey(0)
    k_small, k_big = jax.random.split(key)

    # small shape matching the module's spirit (single-tile grids)
    _run_case(k_small, B=2, T=8, C=32, H=4)
    # larger shape exercising the real machinery: multi-k linear accumulation,
    # multi-tile splash enumeration, multi-head blocks, diagonal masking.
    _run_case(k_big, B=2, T=256, C=128, H=4)

    print("KERNEL_OK")
</pallas_src>

<mosaic_0001>
module attributes {stable_mosaic.version = 11 : i64} {
  func.func @_linear_kernel_inplace(%arg0: i32, %arg1: i32, %arg2: i32, %arg3: memref<16x32xf32, #tpu.memory_space<vmem>>, %arg4: memref<32x96xf32, #tpu.memory_space<vmem>>, %arg5: memref<1x96xf32, #tpu.memory_space<vmem>>, %arg6: memref<16x96xf32, #tpu.memory_space<vmem>>) attributes {dimension_semantics = [#tpu.dimension_semantics<parallel>, #tpu.dimension_semantics<parallel>, #tpu.dimension_semantics<arbitrary>], iteration_bounds = array<i64: 1, 1, 1>, scalar_prefetch = 0 : i64, scratch_operands = 0 : i64, tpu.core_type = #tpu.core_type<tc>, window_params = [{transform_indices = @transform_0, window_bounds = array<i64: 16, 32>}, {transform_indices = @transform_1, window_bounds = array<i64: 32, 96>}, {transform_indices = @transform_2, window_bounds = array<i64: 1, 96>}, {transform_indices = @transform_3, window_bounds = array<i64: 16, 96>}]} {
    %c0_i32 = arith.constant 0 : i32
    %0 = arith.cmpi eq, %arg2, %c0_i32 : i32
    %1 = arith.extui %0 : i1 to i32
    %c0_i32_0 = arith.constant 0 : i32
    %2 = arith.cmpi ne, %1, %c0_i32_0 : i32
    scf.if %2 {
      %cst_10 = arith.constant 0.000000e+00 : f32
      %12 = vector.broadcast %cst_10 : f32 to vector<16x96xf32>
      %c0_11 = arith.constant 0 : index
      %c0_12 = arith.constant 0 : index
      %13 = vector.load %arg6[%c0_11, %c0_12] : memref<16x96xf32, #tpu.memory_space<vmem>>, vector<16x96xf32>
      tpu.vector_store %arg6[%c0_11, %c0_12], %12 {strides = array<i32>} : memref<16x96xf32, #tpu.memory_space<vmem>>, vector<16x96xf32>,
    } else {
    }
    %c0 = arith.constant 0 : index
    %c0_1 = arith.constant 0 : index
    %3 = vector.load %arg6[%c0, %c0_1] : memref<16x96xf32, #tpu.memory_space<vmem>>, vector<16x96xf32>
    %c0_2 = arith.constant 0 : index
    %c0_3 = arith.constant 0 : index
    %4 = vector.load %arg3[%c0_2, %c0_3] : memref<16x32xf32, #tpu.memory_space<vmem>>, vector<16x32xf32>
    %c0_4 = arith.constant 0 : index
    %c0_5 = arith.constant 0 : index
    %5 = vector.load %arg4[%c0_4, %c0_5] : memref<32x96xf32, #tpu.memory_space<vmem>>, vector<32x96xf32>
    %cst = arith.constant dense<0.000000e+00> : vector<16x96xf32>
    %6 = tpu.matmul %4, %5, %cst {dimension_numbers = #tpu.dot_dimension_numbers<[1], [0], [0], [1], [0, 0, 1, 1], [], []>} : vector<16x32xf32>, vector<32x96xf32>, vector<16x96xf32> -> vector<16x96xf32>
    %7 = arith.addf %3, %6 : vector<16x96xf32>
    %c0_6 = arith.constant 0 : index
    %c0_7 = arith.constant 0 : index
    %8 = vector.load %arg6[%c0_6, %c0_7] : memref<16x96xf32, #tpu.memory_space<vmem>>, vector<16x96xf32>
    tpu.vector_store %arg6[%c0_6, %c0_7], %7 {strides = array<i32>} : memref<16x96xf32, #tpu.memory_space<vmem>>, vector<16x96xf32>,
    %c0_i32_8 = arith.constant 0 : i32
    %9 = arith.cmpi eq, %arg2, %c0_i32_8 : i32
    %10 = arith.extui %9 : i1 to i32
    %c0_i32_9 = arith.constant 0 : i32
    %11 = arith.cmpi ne, %10, %c0_i32_9 : i32
    scf.if %11 {
      %c0_10 = arith.constant 0 : index
      %c0_11 = arith.constant 0 : index
      %12 = vector.load %arg6[%c0_10, %c0_11] : memref<16x96xf32, #tpu.memory_space<vmem>>, vector<16x96xf32>
      %c0_12 = arith.constant 0 : index
      %c0_13 = arith.constant 0 : index
      %13 = vector.load %arg5[%c0_12, %c0_13] : memref<1x96xf32, #tpu.memory_space<vmem>>, vector<1x96xf32>
      %14 = vector.broadcast %13 : vector<1x96xf32> to vector<16x96xf32>
      %15 = arith.addf %12, %14 : vector<16x96xf32>
      %c0_14 = arith.constant 0 : index
      %c0_15 = arith.constant 0 : index
      %16 = vector.load %arg6[%c0_14, %c0_15] : memref<16x96xf32, #tpu.memory_space<vmem>>, vector<16x96xf32>
      tpu.vector_store %arg6[%c0_14, %c0_15], %15 {strides = array<i32>} : memref<16x96xf32, #tpu.memory_space<vmem>>, vector<16x96xf32>,
    } else {
    }
    return
  }
  func.func @transform_0(%arg0: i32, %arg1: i32, %arg2: i32) -> (i32, i32) {
    %c0_i32 = arith.constant 0 : i32
    return %arg0, %arg2 : i32, i32
  }
  func.func @transform_1(%arg0: i32, %arg1: i32, %arg2: i32) -> (i32, i32) {
    %c0_i32 = arith.constant 0 : i32
    return %arg2, %arg1 : i32, i32
  }
  func.func @transform_2(%arg0: i32, %arg1: i32, %arg2: i32) -> (i32, i32) {
    %c0_i32 = arith.constant 0 : i32
    %c0_i32_0 = arith.constant 0 : i32
    return %c0_i32, %arg1 : i32, i32
  }
  func.func @transform_3(%arg0: i32, %arg1: i32, %arg2: i32) -> (i32, i32) {
    %c0_i32 = arith.constant 0 : i32
    return %arg0, %arg1 : i32, i32
  }
}

</mosaic_0001>

<bundles_post_ra>
// kernel: tpu_custom_call.1
= control target key start
LH: loop header
LB: loop body
LE: loop exit
PB: predicated region body
PF: predicated region fallthrough
CT: control target
= control target key end

     0   :  { %8 = vsyncpa [#allocation3], 0  ;;  %s274_s0 = inlined_call_operand.hbm [shape: f32[16,32], index: 0, kind: input, shape index: {}]   ;;  %s275_s1 = inlined_call_operand.hbm [shape: f32[32,96], index: 1, kind: input, shape index: {}]   ;;  %s276_s2 = inlined_call_operand.vmem [shape: f32[1,96], index: 2, kind: input, shape index: {}]   ;;  %s277_s3 = inlined_call_operand.hbm [shape: f32[16,96], index: 3, kind: output, shape index: {}]  }
   0x1   :  { %9 = vsyncpa [#allocation6], 0 }
   0x2   :  { %10 = vsyncpa [#allocation4], 0  ;;  %s15_s14 = sshll.u32 %s274_s0, 4  ;;  %s221_s15 = smov [#allocation2]   ;;  %s16_s14 = int_to_ptr.hbm [resolvable:$true] %s15_s14 }
   0x3   :  { %s17_s16 = sshll.u32 %s221_s15, 4  ;;  %s28_s19 = sshll.u32 %s275_s1, 4  ;;  %s18_s16 = int_to_ptr.vmem [resolvable:$true] %s17_s16  ;;  %s29_s19 = int_to_ptr.hbm [resolvable:$true] %s28_s19 }
   0x4   :  { %s222_s20 = smov 128   ;;  %s223_s21 = smov 8  }
   0x5   :  { %23 = dma.hbm_to_vmem [thread:$0]  %s16_s14, 256, %s18_s16, [#allocation3], %s222_s20, %s222_s20, %s223_s21  }
   0x6   :  { %s224_s22 = smov [#allocation5]  }
   0x7   :  { %s30_s23 = sshll.u32 %s224_s22, 4  ;;  %s31_s23 = int_to_ptr.vmem [resolvable:$true] %s30_s23 }
   0x8   :  { %36 = dma.hbm_to_vmem [thread:$0]  %s29_s19, 512, %s31_s23, [#allocation6], %s222_s20, %s222_s20, %s223_s21  }
   0x9   :  { %215 = dma.done.wait [#allocation3], 256  }
   0xa   :  { %216 = vsyncadd [#allocation3], 4294967040 }
   0xb   :  { %217 = dma.done.wait [#allocation6], 512  }
   0xc   :  { %218 = vsyncadd [#allocation6], 4294966784  ;;  %vm51_vm0 = vcmask 785408   ;;  %v225_v0 = vmov 0.0   ;;  %v61_v1 = vld [vmem:[#allocation5 + $0x18] sm:$0xff]  ;;  %v60_v2 = vld [vmem:[#allocation5 + $0x10] sm:$0xff] }
   0xd   :  { %52 = vst.msk [vmem:[#allocation7] sm:$0xff] %vm51_vm0, %v225_v0  ;;  %81 = vmatpush.msra.mxu0 %v61_v1  ;;  %132 = vmatpush.msra.mxu1 %v61_v1  ;;  %v59_v3 = vld [vmem:[#allocation5 + $0x8] sm:$0xff]  ;;  %v58_v4 = vld [vmem:[#allocation5] sm:$0xff]  ;;  %v56_v5 = vld [vmem:[#allocation2] sm:$0xff]  ;;  %vm62_vm1 = vcmask 261120   ;;  %s226_s24 = smov [#allocation7]  }
   0xe   :  { %53 = vst.msk [vmem:[#allocation7 + $0x8] sm:$0xff] %vm51_vm0, %v225_v0  ;;  %v57_v6 = vld [vmem:[#allocation2 + $0x8] sm:$0xff]  ;;  %v142_v13 = vld [vmem:[%s276_s2] ss:$0 sm:$0xff]  ;;  %s114_s25 = sshll.u32 %s226_s24, 4  ;;  %s116_s28 = sshll.u32 %s277_s3, 4  ;;  %s115_s25 = int_to_ptr.vmem [resolvable:$true] %s114_s25  ;;  %s117_s28 = int_to_ptr.hbm [resolvable:$true] %s116_s28 }
   0xf   :  { %82 = vmatpush.msra.mxu0 %v60_v2  ;;  %133 = vmatpush.msra.mxu1 %v60_v2 }
  0x11   :  { %83 = vmatpush.msra.mxu0 %v59_v3  ;;  %134 = vmatpush.msra.mxu1 %v59_v3 }
  0x13   :  { %84 = vmatpush.msra.mxu0 %v58_v4  ;;  %135 = vmatpush.msra.mxu1 %v58_v4 }
  0x14   :  { %130 = vmatmul.msk.f32.vlgmr.msra.gmra.mxu0 %vm62_vm1, %v56_v5  ;;  %131 = vmatmul.msk.f32.vlgmr.msra.gmra.mxu1 %vm62_vm1, %v57_v6  ;;  %v54_v7 = vld [vmem:[#allocation7] sm:$0xff] }
  0x15   :  { %v55_v8 = vld [vmem:[#allocation7 + $0x8] sm:$0xff] }
  0x91   :  { %v86_v9 = vpop.f32.mrf.mxu0  ;;  %v89_v10 = vpop.f32.mrf.mxu1 }
  0x92   :  { %v92_v11 = vadd.f32 %v86_v9, %v54_v7  ;;  %v93_v12 = vadd.f32 %v89_v10, %v55_v8 }
  0x94   :  { %95 = vst.msk [vmem:[#allocation7] sm:$0xff] %vm51_vm0, %v92_v11 }
  0x95   :  { %96 = vst.msk [vmem:[#allocation7 + $0x8] sm:$0xff] %vm51_vm0, %v93_v12 }
  0x9b   :  { %v100_v14 = vld [vmem:[#allocation7] sm:$0xff] }
  0x9c   :  { %v101_v15 = vld [vmem:[#allocation7 + $0x8] sm:$0xff]  ;;  %v106_v16 = vadd.f32 %v142_v13, %v100_v14 }
  0x9d   :  { %v107_v17 = vadd.f32 %v142_v13, %v101_v15 }
  0x9e   :  { %108 = vst.msk [vmem:[#allocation7] sm:$0xff] %vm51_vm0, %v106_v16 }
  0x9f   :  { %109 = vst.msk [vmem:[#allocation7 + $0x8] sm:$0xff] %vm51_vm0, %v107_v17 }
  0xa0   :  { %122 = dma.vmem_to_hbm [thread:$0]  %s115_s25, 256, %s117_s28, [#allocation4], %s222_s20, %s222_s20, %s223_s21  }
  0xa1   :  { %219 = dma.done.wait [#allocation4], 256  }
  0xa2   :  { %220 = vsyncadd [#allocation4], 4294967040 }
  0xa3   :  { %127 = vsyncpa [#allocation3], 1 }
  0xa4   :  { %128 = vsyncpa [#allocation6], 1 }
  0xa5   :  { %129 = vsyncpa [#allocation4], 1 }

</bundles_post_ra>
